<compile_context>
chip_gen: v7x
topology: tpu7x:2x2x1
jax: 0.10.0
libtpu: 0.0.40
codegen_flags: <defaults>
</compile_context>

<pallas_src>
import jax
import jax.numpy as jnp
from jax.experimental import pallas as pl
from jax.experimental.pallas import tpu as pltpu

_LANE = 128
_SUBLANE = 8


def _cdiv(a, b):
    return -(-a // b)


def _round_up(x, m):
    return _cdiv(x, m) * m


def _vmem_capacity_bytes():
    try:
        info = pltpu.get_tpu_info()
        cap = getattr(info, "vmem_capacity_bytes", None)
        if cap:
            return int(cap)
    except Exception:
        pass
    return 64 * 1024 * 1024  # conservative fallback (v7x per-TC VMEM)


def _make_kernel(total_rows, total_cols):
    def kernel(forecast_ref, target_ref, mask_ref, out_ref):
        br, bc = forecast_ref.shape
        f = forecast_ref[...].astype(jnp.float32)
        t = target_ref[...].astype(jnp.float32)
        m = mask_ref[...].astype(jnp.float32)

        # divide_no_nan: a/b with NaN and +inf (only, matching the PyTorch
        # reference which checks `result == np.inf`) replaced by 0.
        w = m / t
        w = jnp.where(jnp.isnan(w), jnp.float32(0.0), w)
        w = jnp.where(w == jnp.inf, jnp.float32(0.0), w)

        contrib = jnp.abs((f - t) * w)

        # Ragged-tail masking: the last block along either axis may extend past
        # the true array bounds (Pallas fills the overhang with unspecified
        # values).  Zero those lanes before reducing.  This VPU work is free
        # filler relative to the HBM DMA.
        row0 = pl.program_id(0) * br
        col0 = pl.program_id(1) * bc
        rid = jax.lax.broadcasted_iota(jnp.int32, (br, bc), 0) + row0
        cid = jax.lax.broadcasted_iota(jnp.int32, (br, bc), 1) + col0
        valid = (rid < total_rows) & (cid < total_cols)
        contrib = jnp.where(valid, contrib, jnp.float32(0.0))

        # One partial sum per grid step -> no cross-step dependency.
        out_ref[0, 0] = jnp.sum(contrib)

    return kernel


def _choose_tiles(rows, cols, in_itemsizes, vmem_cap):
    """Pick (row_tile, col_tile, vmem_limit_bytes) for a (rows, cols) problem."""
    usable = (vmem_cap * 3) // 4  # 48 MiB on v7x, 96 MiB on v5e/v6e
    # Per-input target block bytes: ~8 MiB on v5e/v6e (128 MiB VMEM), ~4 MiB on v7x.
    target_block_bytes = (8 * 1024 * 1024 if vmem_cap >= 100 * 1024 * 1024
                          else 4 * 1024 * 1024)

    # Per-element VMEM cost of one grid step: 3 inputs x 2 pipeline buffers in
    # their HBM dtypes, plus ~5 full-block f32 temporaries for the upcast chain.
    per_elem = 2 * sum(in_itemsizes) + 5 * 4
    max_block_elems = max(_SUBLANE * _LANE, usable // per_elem)
    target_block_elems = max(_SUBLANE * _LANE,
                             target_block_bytes // max(max(in_itemsizes), 1))

    cols_p = _round_up(cols, _LANE)          # lane-padded width of one row in VMEM
    rows_full_width = max_block_elems // cols_p

    if rows_full_width >= min(rows, _SUBLANE):
        # Full-width blocks, tile along rows.
        col_tile = cols
        row_cap = min(rows_full_width,
                      max(_SUBLANE, target_block_elems // cols_p))
        if rows <= row_cap:
            row_tile = rows
        else:
            row_tile = max(_SUBLANE, (row_cap // _SUBLANE) * _SUBLANE)
    else:
        # Even an 8-row full-width block would blow VMEM: tile the columns too.
        row_tile = rows if rows < _SUBLANE else _SUBLANE
        budget = min(max_block_elems, max(target_block_elems, row_tile * _LANE))
        col_cap = max(_LANE, budget // max(row_tile, 1))
        col_tile = max(_LANE, (min(col_cap, cols_p) // _LANE) * _LANE)
        if col_tile >= cols:
            col_tile = cols

    # Megacore: if everything collapsed to a single grid step but the input is
    # big enough to matter, split it so both TensorCores (v7x) get work.
    if (_cdiv(rows, row_tile) * _cdiv(cols, col_tile) == 1
            and rows * cols * max(in_itemsizes) > 2 * 1024 * 1024):
        if rows >= 2 * _SUBLANE:
            row_tile = _round_up(_cdiv(rows, 2), _SUBLANE)
        elif cols >= 2 * _LANE:
            col_tile = _round_up(_cdiv(cols, 2), _LANE)

    return row_tile, col_tile, int(usable)


def mape_loss(insample, freq, forecast, target, mask, *, force_tiles=None):
    """MAPE loss. `insample` and `freq` are unused (as in the PyTorch forward)."""
    del insample, freq  # unused by the reference forward
    B, T = forecast.shape
    n_total = B * T

    # Lane-dense flatten (free row-major reshape) whenever possible: contiguous
    # block DMAs, sublane-dense vregs, block size independent of B.
    if n_total % _LANE == 0:
        rows, cols = n_total // _LANE, _LANE
        forecast = forecast.reshape(rows, cols)
        target = target.reshape(rows, cols)
        mask = mask.reshape(rows, cols)
    else:
        rows, cols = B, T

    itemsizes = (forecast.dtype.itemsize, target.dtype.itemsize,
                 mask.dtype.itemsize)
    vmem_cap = _vmem_capacity_bytes()
    row_tile, col_tile, vmem_limit = _choose_tiles(rows, cols, itemsizes,
                                                   vmem_cap)
    if force_tiles is not None:
        row_tile, col_tile = force_tiles

    nrb = _cdiv(rows, row_tile)
    ncb = _cdiv(cols, col_tile)

    in_spec = pl.BlockSpec((row_tile, col_tile), lambda i, j: (i, j))

    partials = pl.pallas_call(
        _make_kernel(rows, cols),
        out_shape=jax.ShapeDtypeStruct((nrb, ncb), jnp.float32),
        grid_spec=pltpu.PrefetchScalarGridSpec(
            num_scalar_prefetch=0,
            grid=(nrb, ncb),
            in_specs=[in_spec, in_spec, in_spec],
            out_specs=pl.BlockSpec((1, 1), lambda i, j: (i, j),
                                   memory_space=pltpu.SMEM),
        ),
        compiler_params=pltpu.CompilerParams(
            dimension_semantics=("parallel", "parallel"),
            vmem_limit_bytes=vmem_limit,
        ),
    )(forecast, target, mask)

    total = jnp.sum(partials)
    return (total / jnp.float32(n_total)).astype(jnp.float32)


def _ref_mape(forecast, target, mask):
    w = mask / target
    w = jnp.where(jnp.isnan(w), 0.0, w)
    w = jnp.where(w == jnp.inf, 0.0, w)
    return jnp.mean(jnp.abs((forecast - target) * w))


if __name__ == "__main__":
    key = jax.random.PRNGKey(0)
    k1, k2, k3, k4 = jax.random.split(key, 4)

    B, T = 8, 256          # (batch, time) — small demo shape
    IN_LEN, FREQ = 32, 1   # insample / freq are unused in forward

    forecast = jax.random.normal(k1, (B, T), dtype=jnp.float32)
    target = jax.random.normal(k2, (B, T), dtype=jnp.float32)
    # Inject some zeros in target to exercise the divide_no_nan path.
    zero_mask = jax.random.bernoulli(k3, 0.1, (B, T))
    target = jnp.where(zero_mask, 0.0, target)
    mask = jax.random.bernoulli(k4, 0.8, (B, T)).astype(jnp.float32)
    insample = jnp.zeros((B, IN_LEN), dtype=jnp.float32)

    # 1) B*T divisible by 128 -> lane-dense flattened path, single block.
    loss = mape_loss(insample, FREQ, forecast, target, mask)
    jax.block_until_ready(loss)
    ref = _ref_mape(forecast, target, mask)
    assert jnp.allclose(loss, ref, rtol=1e-4, atol=1e-6), (loss, ref)

    # 2) B*T NOT divisible by 128 -> (B, T) path (no padding, no masking needed
    #    since the single block covers the full, non-128-aligned extent).
    T2 = 200
    f2 = jax.random.normal(k1, (B, T2), dtype=jnp.float32)
    t2 = jax.random.normal(k2, (B, T2), dtype=jnp.float32)
    t2 = jnp.where(jax.random.bernoulli(k3, 0.1, (B, T2)), 0.0, t2)
    m2 = jax.random.bernoulli(k4, 0.8, (B, T2)).astype(jnp.float32)
    loss2 = mape_loss(insample, FREQ, f2, t2, m2)
    jax.block_until_ready(loss2)
    ref2 = _ref_mape(f2, t2, m2)
    assert jnp.allclose(loss2, ref2, rtol=1e-4, atol=1e-6), (loss2, ref2)

    # 3) Forced small tiles on the non-aligned shape -> multi-step grid with a
    #    ragged last column-block; exercises the in-kernel iota masking.
    loss3 = mape_loss(insample, FREQ, f2, t2, m2, force_tiles=(8, 128))
    jax.block_until_ready(loss3)
    assert jnp.allclose(loss3, ref2, rtol=1e-4, atol=1e-6), (loss3, ref2)

    # 4) Forced small tiles on the flattened shape -> multi-step parallel grid
    #    over rows (exercises per-step SMEM partials with >1 grid step).
    loss4 = mape_loss(insample, FREQ, forecast, target, mask,
                      force_tiles=(8, 128))
    jax.block_until_ready(loss4)
    assert jnp.allclose(loss4, ref, rtol=1e-4, atol=1e-6), (loss4, ref)

    print("KERNEL_OK")
</pallas_src>

<mosaic_0001>
module attributes {stable_mosaic.version = 11 : i64} {
  func.func @kernel(%arg0: i32, %arg1: i32, %arg2: memref<16x128xf32, #tpu.memory_space<vmem>>, %arg3: memref<16x128xf32, #tpu.memory_space<vmem>>, %arg4: memref<16x128xf32, #tpu.memory_space<vmem>>, %arg5: memref<1x1xf32, #tpu.memory_space<smem>>) attributes {dimension_semantics = [#tpu.dimension_semantics<parallel>, #tpu.dimension_semantics<parallel>], iteration_bounds = array<i64: 1, 1>, scalar_prefetch = 0 : i64, scratch_operands = 0 : i64, tpu.core_type = #tpu.core_type<tc>, window_params = [{transform_indices = @transform_0, window_bounds = array<i64: 16, 128>}, {transform_indices = @transform_1, window_bounds = array<i64: 16, 128>}, {transform_indices = @transform_2, window_bounds = array<i64: 16, 128>}, {transform_indices = @transform_3, window_bounds = array<i64: 1, 1>}]} {
    %c0 = arith.constant 0 : index
    %c0_0 = arith.constant 0 : index
    %0 = vector.load %arg2[%c0, %c0_0] : memref<16x128xf32, #tpu.memory_space<vmem>>, vector<16x128xf32>
    %c0_1 = arith.constant 0 : index
    %c0_2 = arith.constant 0 : index
    %1 = vector.load %arg3[%c0_1, %c0_2] : memref<16x128xf32, #tpu.memory_space<vmem>>, vector<16x128xf32>
    %c0_3 = arith.constant 0 : index
    %c0_4 = arith.constant 0 : index
    %2 = vector.load %arg4[%c0_3, %c0_4] : memref<16x128xf32, #tpu.memory_space<vmem>>, vector<16x128xf32>
    %3 = arith.divf %2, %1 : vector<16x128xf32>
    %4 = arith.cmpf one, %3, %3 : vector<16x128xf32>
    %cst = arith.constant 0.000000e+00 : f32
    %5 = vector.broadcast %cst : f32 to vector<16x128xf32>
    %6 = arith.select %4, %5, %3 : vector<16x128xi1>, vector<16x128xf32>
    %cst_5 = arith.constant 0x7F800000 : f32
    %7 = vector.broadcast %cst_5 : f32 to vector<16x128xf32>
    %8 = arith.cmpf oeq, %6, %7 : vector<16x128xf32>
    %cst_6 = arith.constant 0.000000e+00 : f32
    %9 = vector.broadcast %cst_6 : f32 to vector<16x128xf32>
    %10 = arith.select %8, %9, %6 : vector<16x128xi1>, vector<16x128xf32>
    %11 = arith.subf %0, %1 : vector<16x128xf32>
    %12 = arith.mulf %11, %10 : vector<16x128xf32>
    %13 = math.absf %12 : vector<16x128xf32>
    %c16_i32 = arith.constant 16 : i32
    %14 = arith.muli %arg0, %c16_i32 : i32
    %c128_i32 = arith.constant 128 : i32
    %15 = arith.muli %arg1, %c128_i32 : i32
    %16 = tpu.iota {dimensions = array<i32: 0>} : vector<16x128xi32>
    %17 = vector.broadcast %14 : i32 to vector<16x128xi32>
    %18 = arith.addi %16, %17 : vector<16x128xi32>
    %19 = tpu.iota {dimensions = array<i32: 1>} : vector<16x128xi32>
    %20 = vector.broadcast %15 : i32 to vector<16x128xi32>
    %21 = arith.addi %19, %20 : vector<16x128xi32>
    %c16_i32_7 = arith.constant 16 : i32
    %22 = vector.broadcast %c16_i32_7 : i32 to vector<16x128xi32>
    %23 = arith.cmpi slt, %18, %22 : vector<16x128xi32>
    %c128_i32_8 = arith.constant 128 : i32
    %24 = vector.broadcast %c128_i32_8 : i32 to vector<16x128xi32>
    %25 = arith.cmpi slt, %21, %24 : vector<16x128xi32>
    %26 = arith.andi %23, %25 : vector<16x128xi1>
    %cst_9 = arith.constant 0.000000e+00 : f32
    %27 = vector.broadcast %cst_9 : f32 to vector<16x128xf32>
    %28 = arith.select %26, %13, %27 : vector<16x128xi1>, vector<16x128xf32>
    %29 = vector.shape_cast %28 : vector<16x128xf32> to vector<1x16x128xf32>
    %cst_10 = arith.constant dense<0.000000e+00> : vector<1xf32>
    %30 = vector.multi_reduction <add>, %29, %cst_10 [1, 2] : vector<1x16x128xf32> to vector<1xf32>
    %31 = vector.shape_cast %30 : vector<1xf32> to vector<1x1x1xf32>
    %32 = vector.extract %31[0, 0, 0] : f32 from vector<1x1x1xf32>
    %c0_11 = arith.constant 0 : index
    %c0_12 = arith.constant 0 : index
    %33 = memref.load %arg5[%c0_11, %c0_12] : memref<1x1xf32, #tpu.memory_space<smem>>
    memref.store %32, %arg5[%c0_11, %c0_12] : memref<1x1xf32, #tpu.memory_space<smem>>
    return
  }
  func.func @transform_0(%arg0: i32, %arg1: i32) -> (i32, i32) {
    %c0_i32 = arith.constant 0 : i32
    return %arg0, %arg1 : i32, i32
  }
  func.func @transform_1(%arg0: i32, %arg1: i32) -> (i32, i32) {
    %c0_i32 = arith.constant 0 : i32
    return %arg0, %arg1 : i32, i32
  }
  func.func @transform_2(%arg0: i32, %arg1: i32) -> (i32, i32) {
    %c0_i32 = arith.constant 0 : i32
    return %arg0, %arg1 : i32, i32
  }
  func.func @transform_3(%arg0: i32, %arg1: i32) -> (i32, i32) {
    %c0_i32 = arith.constant 0 : i32
    return %arg0, %arg1 : i32, i32
  }
}

</mosaic_0001>

<bundles_post_ra>
// kernel: tpu_custom_call.1
= control target key start
LH: loop header
LB: loop body
LE: loop exit
PB: predicated region body
PF: predicated region fallthrough
CT: control target
= control target key end

     0   :  { %8 = vsyncpa [#allocation3], 0  ;;  %s310_s0 = inlined_call_operand.hbm [shape: f32[16,128], index: 0, kind: input, shape index: {}]   ;;  %s311_s1 = inlined_call_operand.hbm [shape: f32[16,128], index: 1, kind: input, shape index: {}]   ;;  %s312_s2 = inlined_call_operand.hbm [shape: f32[16,128], index: 2, kind: input, shape index: {}]   ;;  %s313_s3 = inlined_call_operand.hbm [shape: f32[1,1], index: 3, kind: output, shape index: {}]  }
   0x1   :  { %9 = vsyncpa [#allocation6], 0 }
   0x2   :  { %10 = vsyncpa [#allocation4], 0  ;;  %s220_s12 = smov [#allocation5]   ;;  %s221_s14 = smov [#allocation2]  }
   0x3   :  { %s28_s13 = sshll.u32 %s220_s12, 4  ;;  %s16_s15 = sshll.u32 %s221_s14, 4  ;;  %s29_s13 = int_to_ptr.vmem [resolvable:$true] %s28_s13  ;;  %s246_s15 = int_to_ptr.vmem [resolvable:$true] %s16_s15 }
   0x4   :  { %s138_s18 = scalar_lea.hbm %s311_s1, 256 }
   0x5   :  { %p139_p0 = scmp.ne.s32.totalorder %s311_s1, %s138_s18  ;;  %p142_p1 = scmp.lt.u32.totalorder %s138_s18, %s311_s1 }
   0x7   :  { %p144_p2 = pnand %p142_p1, %p139_p0 }
   0x9   :  { %147 = shalt.err (!%p144_p2)
}
   0xa   :  { %s148_s23 = scalar_lea.vmem %s29_s13, 256  ;;  %p153_p4 = scmp.lt.s32.totalorder %s29_s13, %s29_s13 }
   0xb   :  { %p149_p3 = scmp.ne.s32.totalorder %s29_s13, %s148_s23  ;;  %p154_p5 = scmp.lt.s32.totalorder %s148_s23, %s148_s23 }
   0xd   :  { %p155_p6 = por %p154_p5, %p153_p4 }
   0xf   :  { %p156_p7 = pnand %p155_p6, %p149_p3 }
  0x11   :  { %159 = shalt.err (!%p156_p7)
}
  0x12   :  { %s222_s24 = smov 128   ;;  %s223_s25 = smov 8  }
  0x13   :  { %34 = dma.hbm_to_vmem [thread:$0]  %s311_s1, 256, %s29_s13, [#allocation6], %s222_s24, %s222_s24, %s223_s25  }
  0x14   :  { %s160_s30 = scalar_lea.hbm %s310_s0, 256 }
  0x15   :  { %p161_p8 = scmp.ne.s32.totalorder %s310_s0, %s160_s30  ;;  %p164_p9 = scmp.lt.u32.totalorder %s160_s30, %s310_s0 }
  0x17   :  { %p166_p10 = pnand %p164_p9, %p161_p8 }
  0x19   :  { %169 = shalt.err (!%p166_p10)
}
  0x1a   :  { %s170_s8 = scalar_lea.vmem %s246_s15, 256  ;;  %p175_p12 = scmp.lt.s32.totalorder %s246_s15, %s246_s15 }
  0x1b   :  { %p171_p11 = scmp.ne.s32.totalorder %s246_s15, %s170_s8  ;;  %p176_p13 = scmp.lt.s32.totalorder %s170_s8, %s170_s8 }
  0x1d   :  { %p177_p0 = por %p176_p13, %p175_p12 }
  0x1f   :  { %p178_p1 = pnand %p177_p0, %p171_p11 }
  0x21   :  { %181 = shalt.err (!%p178_p1)
}
  0x22   :  { %22 = dma.hbm_to_vmem [thread:$0]  %s310_s0, 256, %s246_s15, [#allocation3], %s222_s24, %s222_s24, %s223_s25  }
  0x23   :  { %s224_s10 = smov [#allocation7]   ;;  %s182_s14 = scalar_lea.hbm %s312_s2, 256 }
  0x24   :  { %s40_s11 = sshll.u32 %s224_s10, 4  ;;  %p183_p2 = scmp.ne.s32.totalorder %s312_s2, %s182_s14  ;;  %s41_s11 = int_to_ptr.vmem [resolvable:$true] %s40_s11 }
  0x25   :  { %p186_p3 = scmp.lt.u32.totalorder %s182_s14, %s312_s2 }
  0x27   :  { %p188_p4 = pnand %p186_p3, %p183_p2 }
  0x29   :  { %191 = shalt.err (!%p188_p4)
}
  0x2a   :  { %s192_s20 = scalar_lea.vmem %s41_s11, 256  ;;  %p197_p6 = scmp.lt.s32.totalorder %s41_s11, %s41_s11 }
  0x2b   :  { %p193_p5 = scmp.ne.s32.totalorder %s41_s11, %s192_s20  ;;  %p198_p7 = scmp.lt.s32.totalorder %s192_s20, %s192_s20 }
  0x2d   :  { %p199_p8 = por %p198_p7, %p197_p6 }
  0x2f   :  { %p200_p9 = pnand %p199_p8, %p193_p5 }
  0x31   :  { %203 = shalt.err (!%p200_p9)
}
  0x32   :  { %46 = dma.hbm_to_vmem [thread:$0]  %s312_s2, 256, %s41_s11, [#allocation6], %s222_s24, %s222_s24, %s223_s25  }
  0x33   :  { %214 = dma.done.wait [#allocation3], 256  }
  0x34   :  { %215 = vsyncadd [#allocation3], 4294967040 }
  0x35   :  { %216 = dma.done.wait [#allocation6], 512  }
  0x36   :  { %217 = vsyncadd [#allocation6], 4294966784  ;;  %v58_v0 = vld [vmem:[#allocation5] sm:$0xff]  ;;  %v59_v1 = vld [vmem:[#allocation5 + $0x8] sm:$0xff]  ;;  %s204_s23 = scalar_lea.hbm %s313_s3, 16 }
  0x37   :  { %134 = vrcp.f32 %v58_v0  ;;  %v60_v2 = vld [vmem:[#allocation7] sm:$0xff]  ;;  %v61_v3 = vld [vmem:[#allocation7 + $0x8] sm:$0xff]  ;;  %p205_p10 = scmp.ne.s32.totalorder %s313_s3, %s204_s23  ;;  %p208_p11 = scmp.lt.u32.totalorder %s204_s23, %s313_s3 }
  0x38   :  { %136 = vrcp.f32 %v59_v1  ;;  %v56_v5 = vld [vmem:[#allocation2] sm:$0xff]  ;;  %v57_v7 = vld [vmem:[#allocation2 + $0x8] sm:$0xff] }
  0x39   :  { %v74_v10 = vsub.f32 %v56_v5, %v58_v0  ;;  %v75_v12 = vsub.f32 %v57_v7, %v59_v1  ;;  %p210_p12 = pnand %p208_p11, %p205_p10 }
  0x41   :  { %v135_v4 = vpop.eup %134 }
  0x42   :  { %v137_v6 = vpop.eup %136  ;;  %v63_v8 = vmul.f32 %v135_v4, %v60_v2 }
  0x43   :  { %v65_v9 = vmul.f32 %v137_v6, %v61_v3 }
  0x44   :  { %vm66_vm0 = vcmp.ne.f32.partialorder %v63_v8, %v63_v8 }
  0x45   :  { %vm67_vm1 = vcmp.ne.f32.partialorder %v65_v9, %v65_v9  ;;  %v68_v11 = vsel %vm66_vm0, 0.0, %v63_v8 }
  0x46   :  { %v69_v13 = vsel %vm67_vm1, 0.0, %v65_v9  ;;  %vm70_vm2 = vcmp.eq.f32.partialorder %v68_v11, inf }
  0x47   :  { %vm71_vm3 = vcmp.eq.f32.partialorder %v69_v13, inf  ;;  %v72_v14 = vsel %vm70_vm2, 0.0, %v68_v11 }
  0x48   :  { %v73_v15 = vsel %vm71_vm3, 0.0, %v69_v13  ;;  %v76_v16 = vmul.f32 %v74_v10, %v72_v14 }
  0x49   :  { %v77_v17 = vmul.f32 %v75_v12, %v73_v15 }
  0x4a   :  { %v78_v18 = vand.u32 2147483647, %v76_v16 }
  0x4b   :  { %v79_v19 = vand.u32 2147483647, %v77_v17 }
  0x4d   :  { %v99_v20 = vadd.f32 %v79_v19, %v78_v18 }
  0x4f   :  { %100 = vadd.xlane.f32.xlu0 %v99_v20 }
  0xdc   :  { %v101_v21 = vpop.xlane.xlu0 %100 }
  0xdd   :  { %v102_v22 = vrot.slane %v101_v21, 4 }
  0xdf   :  { %v103_v23 = vadd.f32 %v102_v22, %v101_v21 }
  0xe1   :  { %v104_v24 = vrot.slane %v103_v23, 2 }
  0xe3   :  { %v105_v25 = vadd.f32 %v104_v24, %v103_v23 }
  0xe5   :  { %v106_v26 = vrot.slane %v105_v25, 1 }
  0xe7   :  { %v107_v27 = vadd.f32 %v106_v26, %v105_v25 }
  0xe9   :  { %126 = vpush %v107_v27 }
 0x11a   :  { %s127_s2 = spop %126 }
 0x11b   :  { %110 = sst [smem:[#allocation8]] %s127_s2 }
 0x11c   :  { %213 = shalt.err (!%p210_p12)
}
 0x11d   :  { %s225_s28 = smov [#allocation8]  }
 0x11e   :  { %118 = dma.smem_to_hbm %s225_s28, 16, %s313_s3, [#allocation4]  }
 0x11f   :  { %218 = dma.done.wait [#allocation4], 16  }
 0x120   :  { %219 = vsyncadd [#allocation4], 4294967280 }
 0x121   :  { %122 = sfence }
 0x122   :  { %123 = vsyncpa [#allocation3], 1 }
 0x123   :  { %124 = vsyncpa [#allocation6], 1 }
 0x124   :  { %125 = vsyncpa [#allocation4], 1 }

</bundles_post_ra>
